<compile_context>
chip_gen: v5e
topology: v5e:2x2
jax: 0.10.0
libtpu: 0.0.40
codegen_flags: <defaults>
</compile_context>

<pallas_src>
import jax
import jax.numpy as jnp
from jax import lax
from jax.experimental import pallas as pl
from jax.experimental.pallas import tpu as pltpu


def _sh_attention_kernel(xq_ref, xk_ref, xv_ref,
                         wqT_ref, wkT_ref, wvT_ref,
                         z_ref, attn_ref,
                         k_scr, v_scr):
    # Block shapes (static):
    #   xq_ref: (1, TQ, D)      xk_ref / xv_ref: (1, Skv, D)
    #   wqT/wkT/wvT_ref: (D, D) pre-transposed; wqT already holds 1/sqrt(D)
    #   z_ref: (1, TQ, D)       attn_ref: (1, TQ, Skv)
    #   k_scr / v_scr: (Skv, D) f32 VMEM scratch (persist across the qi axis)
    qi = pl.program_id(1)

    # Project K and V once per batch element; reuse across query tiles.
    @pl.when(qi == 0)
    def _():
        k_scr[...] = jnp.dot(xk_ref[0], wkT_ref[...],
                             preferred_element_type=jnp.float32)
        v_scr[...] = jnp.dot(xv_ref[0], wvT_ref[...],
                             preferred_element_type=jnp.float32)

    # Q projection for this tile; 1/sqrt(D) already folded into wqT.
    q = jnp.dot(xq_ref[0], wqT_ref[...],
                preferred_element_type=jnp.float32)              # (TQ, D)

    # scores = q @ k.T without materializing a transpose.
    s = lax.dot_general(q, k_scr[...],
                        dimension_numbers=(((1,), (1,)), ((), ())),
                        preferred_element_type=jnp.float32)      # (TQ, Skv)

    # Numerically-stable softmax along the key axis.
    s_max = jnp.max(s, axis=-1, keepdims=True)
    p = jnp.exp(s - s_max)
    p = p * pl.reciprocal(jnp.sum(p, axis=-1, keepdims=True), approx=True)

    z = jnp.dot(p, v_scr[...], preferred_element_type=jnp.float32)  # (TQ, D)

    z_ref[0] = z.astype(z_ref.dtype)
    attn_ref[0] = p.astype(attn_ref.dtype)


def _pick_q_tile(sq):
    for t in (512, 256, 128):
        if sq % t == 0:
            return t
    return sq  # small / odd Sq: one tile equal to the full dim (always legal)


@jax.jit
def sh_self_attention(xq, xk, xv, wq, wk, wv):
    """Pallas implementation of SH_SelfAttention.forward.

    xq: (B, Sq, D), xk/xv: (B, Skv, D)
    wq/wk/wv: (D, D) nn.Linear weights in (out, in) layout, no bias.
    Returns (z (B, Sq, D), attn (B, Sq, Skv)) in the input dtype.
    """
    B, Sq, D = xq.shape
    Skv = xk.shape[1]
    TQ = _pick_q_tile(Sq)
    n_q_tiles = Sq // TQ

    # One-time wrapper-side weight prep (XLA, outside the kernel):
    #   * transpose to (in, out) so the kernel never transposes,
    #   * fold the full 1/sqrt(D) attention scale into Wq.
    scale = 1.0 / (float(D) ** 0.5)
    wq_t = (wq.T * scale).astype(xq.dtype)
    wk_t = wk.T.astype(xk.dtype)
    wv_t = wv.T.astype(xv.dtype)

    out_shape = (
        jax.ShapeDtypeStruct((B, Sq, D), xq.dtype),
        jax.ShapeDtypeStruct((B, Sq, Skv), xq.dtype),
    )

    grid_spec = pltpu.PrefetchScalarGridSpec(
        num_scalar_prefetch=0,
        grid=(B, n_q_tiles),
        in_specs=[
            pl.BlockSpec((1, TQ, D), lambda b, qi: (b, qi, 0)),   # xq tile
            pl.BlockSpec((1, Skv, D), lambda b, qi: (b, 0, 0)),   # xk (resident over qi)
            pl.BlockSpec((1, Skv, D), lambda b, qi: (b, 0, 0)),   # xv (resident over qi)
            pl.BlockSpec((D, D), lambda b, qi: (0, 0)),           # Wq.T / sqrt(D)
            pl.BlockSpec((D, D), lambda b, qi: (0, 0)),           # Wk.T
            pl.BlockSpec((D, D), lambda b, qi: (0, 0)),           # Wv.T
        ],
        out_specs=[
            pl.BlockSpec((1, TQ, D), lambda b, qi: (b, qi, 0)),   # z
            pl.BlockSpec((1, TQ, Skv), lambda b, qi: (b, qi, 0)), # attn
        ],
        scratch_shapes=[
            pltpu.VMEM((Skv, D), jnp.float32),                    # projected K
            pltpu.VMEM((Skv, D), jnp.float32),                    # projected V
        ],
    )

    # Size the scoped VMEM limit from the actual (double-buffered) footprint.
    itemsize = jnp.dtype(xq.dtype).itemsize
    vmem_bytes = (
        2 * (TQ * D) * itemsize          # xq blocks
        + 2 * 2 * (Skv * D) * itemsize   # xk / xv blocks
        + 2 * 3 * (D * D) * itemsize     # weight blocks
        + 2 * (TQ * D) * itemsize        # z output blocks
        + 2 * (TQ * Skv) * itemsize      # attn output blocks
        + 2 * (Skv * D) * 4              # k/v f32 scratch
        + 6 * (TQ * Skv) * 4             # softmax temporaries headroom
    )
    vmem_limit = int(min(max(2 * vmem_bytes, 32 * 1024 * 1024),
                         96 * 1024 * 1024))

    return pl.pallas_call(
        _sh_attention_kernel,
        out_shape=out_shape,
        grid_spec=grid_spec,
        compiler_params=pltpu.CompilerParams(
            dimension_semantics=("parallel", "arbitrary"),
            vmem_limit_bytes=vmem_limit),
    )(xq, xk, xv, wq_t, wk_t, wv_t)


def _reference(xq, xk, xv, wq, wk, wv):
    """Pure-JAX reference mirroring the PyTorch forward exactly."""
    D = xq.shape[-1]
    q = xq @ wq.T
    k = xk @ wk.T
    v = xv @ wv.T
    scale = float(D) ** 0.25
    s = jnp.einsum("bqd,bkd->bqk", q / scale, k / scale)
    p = jax.nn.softmax(s, axis=2)
    z = jnp.einsum("bqk,bkd->bqd", p, v)
    return z, p


if __name__ == "__main__":
    # Small deterministic problem: batch=2, seq=8, input_size=32.
    B, S, D = 2, 8, 32

    key = jax.random.PRNGKey(0)
    k0, k1, k2, k3, k4, k5 = jax.random.split(key, 6)
    xq = jax.random.normal(k0, (B, S, D), jnp.float32)
    xk = jax.random.normal(k1, (B, S, D), jnp.float32)
    xv = jax.random.normal(k2, (B, S, D), jnp.float32)
    # Deterministic synthetic parameters (not a checkpoint load).
    wq = jax.random.normal(k3, (D, D), jnp.float32) * 0.1
    wk = jax.random.normal(k4, (D, D), jnp.float32) * 0.1
    wv = jax.random.normal(k5, (D, D), jnp.float32) * 0.1

    z, attn = sh_self_attention(xq, xk, xv, wq, wk, wv)
    jax.block_until_ready((z, attn))

    z_ref, attn_ref = _reference(xq, xk, xv, wq, wk, wv)
    # Slightly relaxed tolerances: approx-reciprocal softmax + folded scale.
    assert jnp.allclose(z, z_ref, atol=2e-3, rtol=2e-3), "z mismatch"
    assert jnp.allclose(attn, attn_ref, atol=2e-3, rtol=2e-3), "attn mismatch"

    print("KERNEL_OK")
</pallas_src>

<mosaic_0001>
module attributes {stable_mosaic.version = 11 : i64} {
  func.func @_sh_attention_kernel(%arg0: i32, %arg1: i32, %arg2: memref<1x8x32xf32, #tpu.memory_space<vmem>>, %arg3: memref<1x8x32xf32, #tpu.memory_space<vmem>>, %arg4: memref<1x8x32xf32, #tpu.memory_space<vmem>>, %arg5: memref<32x32xf32, #tpu.memory_space<vmem>>, %arg6: memref<32x32xf32, #tpu.memory_space<vmem>>, %arg7: memref<32x32xf32, #tpu.memory_space<vmem>>, %arg8: memref<1x8x32xf32, #tpu.memory_space<vmem>>, %arg9: memref<1x8x8xf32, #tpu.memory_space<vmem>>, %arg10: memref<8x32xf32, #tpu.memory_space<vmem>>, %arg11: memref<8x32xf32, #tpu.memory_space<vmem>>) attributes {dimension_semantics = [#tpu.dimension_semantics<parallel>, #tpu.dimension_semantics<arbitrary>], iteration_bounds = array<i64: 2, 1>, scalar_prefetch = 0 : i64, scratch_operands = 2 : i64, tpu.core_type = #tpu.core_type<tc>, window_params = [{transform_indices = @transform_0, window_bounds = array<i64: 1, 8, 32>}, {transform_indices = @transform_1, window_bounds = array<i64: 1, 8, 32>}, {transform_indices = @transform_2, window_bounds = array<i64: 1, 8, 32>}, {pipeline_mode = #tpu.pipeline_mode<synchronous>, transform_indices = @transform_3, window_bounds = array<i64: 32, 32>}, {pipeline_mode = #tpu.pipeline_mode<synchronous>, transform_indices = @transform_4, window_bounds = array<i64: 32, 32>}, {pipeline_mode = #tpu.pipeline_mode<synchronous>, transform_indices = @transform_5, window_bounds = array<i64: 32, 32>}, {transform_indices = @transform_6, window_bounds = array<i64: 1, 8, 32>}, {transform_indices = @transform_7, window_bounds = array<i64: 1, 8, 8>}]} {
    %c0_i32 = arith.constant 0 : i32
    %0 = arith.cmpi eq, %arg1, %c0_i32 : i32
    %1 = arith.extui %0 : i1 to i32
    %c0_i32_0 = arith.constant 0 : i32
    %2 = arith.cmpi ne, %1, %c0_i32_0 : i32
    scf.if %2 {
      %c0_19 = arith.constant 0 : index
      %c0_20 = arith.constant 0 : index
      %c0_21 = arith.constant 0 : index
      %27 = vector.load %arg3[%c0_19, %c0_20, %c0_21] : memref<1x8x32xf32, #tpu.memory_space<vmem>>, vector<1x8x32xf32>
      %28 = vector.shape_cast %27 : vector<1x8x32xf32> to vector<8x32xf32>
      %c0_22 = arith.constant 0 : index
      %c0_23 = arith.constant 0 : index
      %29 = vector.load %arg6[%c0_22, %c0_23] : memref<32x32xf32, #tpu.memory_space<vmem>>, vector<32x32xf32>
      %cst_24 = arith.constant dense<0.000000e+00> : vector<8x32xf32>
      %30 = tpu.matmul %28, %29, %cst_24 {dimension_numbers = #tpu.dot_dimension_numbers<[1], [0], [0], [1], [0, 0, 1, 1], [], []>} : vector<8x32xf32>, vector<32x32xf32>, vector<8x32xf32> -> vector<8x32xf32>
      %c0_25 = arith.constant 0 : index
      %c0_26 = arith.constant 0 : index
      %31 = vector.load %arg10[%c0_25, %c0_26] : memref<8x32xf32, #tpu.memory_space<vmem>>, vector<8x32xf32>
      tpu.vector_store %arg10[%c0_25, %c0_26], %30 {strides = array<i32>} : memref<8x32xf32, #tpu.memory_space<vmem>>, vector<8x32xf32>,
      %c0_27 = arith.constant 0 : index
      %c0_28 = arith.constant 0 : index
      %c0_29 = arith.constant 0 : index
      %32 = vector.load %arg4[%c0_27, %c0_28, %c0_29] : memref<1x8x32xf32, #tpu.memory_space<vmem>>, vector<1x8x32xf32>
      %33 = vector.shape_cast %32 : vector<1x8x32xf32> to vector<8x32xf32>
      %c0_30 = arith.constant 0 : index
      %c0_31 = arith.constant 0 : index
      %34 = vector.load %arg7[%c0_30, %c0_31] : memref<32x32xf32, #tpu.memory_space<vmem>>, vector<32x32xf32>
      %cst_32 = arith.constant dense<0.000000e+00> : vector<8x32xf32>
      %35 = tpu.matmul %33, %34, %cst_32 {dimension_numbers = #tpu.dot_dimension_numbers<[1], [0], [0], [1], [0, 0, 1, 1], [], []>} : vector<8x32xf32>, vector<32x32xf32>, vector<8x32xf32> -> vector<8x32xf32>
      %c0_33 = arith.constant 0 : index
      %c0_34 = arith.constant 0 : index
      %36 = vector.load %arg11[%c0_33, %c0_34] : memref<8x32xf32, #tpu.memory_space<vmem>>, vector<8x32xf32>
      tpu.vector_store %arg11[%c0_33, %c0_34], %35 {strides = array<i32>} : memref<8x32xf32, #tpu.memory_space<vmem>>, vector<8x32xf32>,
    } else {
    }
    %c0 = arith.constant 0 : index
    %c0_1 = arith.constant 0 : index
    %c0_2 = arith.constant 0 : index
    %3 = vector.load %arg2[%c0, %c0_1, %c0_2] : memref<1x8x32xf32, #tpu.memory_space<vmem>>, vector<1x8x32xf32>
    %4 = vector.shape_cast %3 : vector<1x8x32xf32> to vector<8x32xf32>
    %c0_3 = arith.constant 0 : index
    %c0_4 = arith.constant 0 : index
    %5 = vector.load %arg5[%c0_3, %c0_4] : memref<32x32xf32, #tpu.memory_space<vmem>>, vector<32x32xf32>
    %cst = arith.constant dense<0.000000e+00> : vector<8x32xf32>
    %6 = tpu.matmul %4, %5, %cst {dimension_numbers = #tpu.dot_dimension_numbers<[1], [0], [0], [1], [0, 0, 1, 1], [], []>} : vector<8x32xf32>, vector<32x32xf32>, vector<8x32xf32> -> vector<8x32xf32>
    %c0_5 = arith.constant 0 : index
    %c0_6 = arith.constant 0 : index
    %7 = vector.load %arg10[%c0_5, %c0_6] : memref<8x32xf32, #tpu.memory_space<vmem>>, vector<8x32xf32>
    %cst_7 = arith.constant dense<0.000000e+00> : vector<8x8xf32>
    %8 = tpu.matmul %6, %7, %cst_7 {dimension_numbers = #tpu.dot_dimension_numbers<[1], [1], [0], [0], [0, 0, 1, 0], [], []>} : vector<8x32xf32>, vector<8x32xf32>, vector<8x8xf32> -> vector<8x8xf32>
    %cst_8 = arith.constant dense<0xFF800000> : vector<8xf32>
    %9 = vector.multi_reduction <maximumf>, %8, %cst_8 [1] : vector<8x8xf32> to vector<8xf32>
    %10 = vector.shape_cast %9 : vector<8xf32> to vector<8x1xf32>
    %11 = vector.broadcast %10 : vector<8x1xf32> to vector<8x8xf32>
    %12 = arith.subf %8, %11 : vector<8x8xf32>
    %13 = math.exp %12 : vector<8x8xf32>
    %cst_9 = arith.constant dense<0.000000e+00> : vector<8xf32>
    %14 = vector.multi_reduction <add>, %13, %cst_9 [1] : vector<8x8xf32> to vector<8xf32>
    %15 = vector.shape_cast %14 : vector<8xf32> to vector<8x1xf32>
    %16 = tpu.reciprocal %15 {approx = true} : vector<8x1xf32> -> vector<8x1xf32>
    %17 = vector.broadcast %16 : vector<8x1xf32> to vector<8x8xf32>
    %18 = arith.mulf %13, %17 : vector<8x8xf32>
    %c0_10 = arith.constant 0 : index
    %c0_11 = arith.constant 0 : index
    %19 = vector.load %arg11[%c0_10, %c0_11] : memref<8x32xf32, #tpu.memory_space<vmem>>, vector<8x32xf32>
    %cst_12 = arith.constant dense<0.000000e+00> : vector<8x32xf32>
    %20 = tpu.matmul %18, %19, %cst_12 {dimension_numbers = #tpu.dot_dimension_numbers<[1], [0], [0], [1], [0, 0, 1, 1], [], []>} : vector<8x8xf32>, vector<8x32xf32>, vector<8x32xf32> -> vector<8x32xf32>
    %c0_13 = arith.constant 0 : index
    %c0_14 = arith.constant 0 : index
    %c0_15 = arith.constant 0 : index
    %21 = vector.load %arg8[%c0_13, %c0_14, %c0_15] : memref<1x8x32xf32, #tpu.memory_space<vmem>>, vector<1x8x32xf32>
    %22 = vector.shape_cast %21 : vector<1x8x32xf32> to vector<8x32xf32>
    %23 = vector.shape_cast %20 : vector<8x32xf32> to vector<1x8x32xf32>
    tpu.vector_store %arg8[%c0_13, %c0_14, %c0_15], %23 {strides = array<i32>} : memref<1x8x32xf32, #tpu.memory_space<vmem>>, vector<1x8x32xf32>,
    %c0_16 = arith.constant 0 : index
    %c0_17 = arith.constant 0 : index
    %c0_18 = arith.constant 0 : index
    %24 = vector.load %arg9[%c0_16, %c0_17, %c0_18] : memref<1x8x8xf32, #tpu.memory_space<vmem>>, vector<1x8x8xf32>
    %25 = vector.shape_cast %24 : vector<1x8x8xf32> to vector<8x8xf32>
    %26 = vector.shape_cast %18 : vector<8x8xf32> to vector<1x8x8xf32>
    tpu.vector_store %arg9[%c0_16, %c0_17, %c0_18], %26 {strides = array<i32>} : memref<1x8x8xf32, #tpu.memory_space<vmem>>, vector<1x8x8xf32>,
    return
  }
  func.func @transform_0(%arg0: i32, %arg1: i32) -> (i32, i32, i32) {
    %c0_i32 = arith.constant 0 : i32
    %c0_i32_0 = arith.constant 0 : i32
    return %arg0, %arg1, %c0_i32 : i32, i32, i32
  }
  func.func @transform_1(%arg0: i32, %arg1: i32) -> (i32, i32, i32) {
    %c0_i32 = arith.constant 0 : i32
    %c0_i32_0 = arith.constant 0 : i32
    %c0_i32_1 = arith.constant 0 : i32
    return %arg0, %c0_i32, %c0_i32_0 : i32, i32, i32
  }
  func.func @transform_2(%arg0: i32, %arg1: i32) -> (i32, i32, i32) {
    %c0_i32 = arith.constant 0 : i32
    %c0_i32_0 = arith.constant 0 : i32
    %c0_i32_1 = arith.constant 0 : i32
    return %arg0, %c0_i32, %c0_i32_0 : i32, i32, i32
  }
  func.func @transform_3(%arg0: i32, %arg1: i32) -> (i32, i32) {
    %c0_i32 = arith.constant 0 : i32
    %c0_i32_0 = arith.constant 0 : i32
    %c0_i32_1 = arith.constant 0 : i32
    return %c0_i32, %c0_i32_0 : i32, i32
  }
  func.func @transform_4(%arg0: i32, %arg1: i32) -> (i32, i32) {
    %c0_i32 = arith.constant 0 : i32
    %c0_i32_0 = arith.constant 0 : i32
    %c0_i32_1 = arith.constant 0 : i32
    return %c0_i32, %c0_i32_0 : i32, i32
  }
  func.func @transform_5(%arg0: i32, %arg1: i32) -> (i32, i32) {
    %c0_i32 = arith.constant 0 : i32
    %c0_i32_0 = arith.constant 0 : i32
    %c0_i32_1 = arith.constant 0 : i32
    return %c0_i32, %c0_i32_0 : i32, i32
  }
  func.func @transform_6(%arg0: i32, %arg1: i32) -> (i32, i32, i32) {
    %c0_i32 = arith.constant 0 : i32
    %c0_i32_0 = arith.constant 0 : i32
    return %arg0, %arg1, %c0_i32 : i32, i32, i32
  }
  func.func @transform_7(%arg0: i32, %arg1: i32) -> (i32, i32, i32) {
    %c0_i32 = arith.constant 0 : i32
    %c0_i32_0 = arith.constant 0 : i32
    return %arg0, %arg1, %c0_i32 : i32, i32, i32
  }
}

</mosaic_0001>

<bundles_post_ra>
// kernel: sh_self_attention.1
= control target key start
LH: loop header
LB: loop body
LE: loop exit
PB: predicated region body
PF: predicated region fallthrough
CT: control target
= control target key end

     0   :  { %s1076_s0 = inlined_call_operand.vmem [shape: f32[2,8,32], index: 0, kind: input, shape index: {}]   ;;  %s1077_s1 = inlined_call_operand.vmem [shape: f32[2,8,32], index: 1, kind: input, shape index: {}]   ;;  %s1078_s2 = inlined_call_operand.vmem [shape: f32[2,8,32], index: 2, kind: input, shape index: {}]   ;;  %s1079_s3 = inlined_call_operand.vmem [shape: f32[32,32], index: 3, kind: input, shape index: {}]   ;;  %s1080_s4 = inlined_call_operand.vmem [shape: f32[32,32], index: 4, kind: input, shape index: {}]   ;;  %s1081_s5 = inlined_call_operand.vmem [shape: f32[32,32], index: 5, kind: input, shape index: {}]   ;;  %s1082_s6 = inlined_call_operand.hbm [shape: f32[2,8,32], index: 6, kind: output, shape index: {0}]   ;;  %s1083_s7 = inlined_call_operand.hbm [shape: f32[2,8,8], index: 7, kind: output, shape index: {1}]  }
   0x1   :  { %1084 = sst [smem:[#allocation10_spill]] %s1076_s0 }
   0x2   :  { %1085 = sst [smem:[#allocation11_spill]] %s1077_s1 }
   0x3   :  { %1086 = sst [smem:[#allocation12_spill]] %s1078_s2 }
   0x4   :  { %13 = vsyncpa [#allocation5], 0 }
   0x5   :  { %15 = vsyncpa [#allocation5 + $0x1], 0 }
   0x6   :  { %16 = vsyncpa [#allocation7], 0 }
   0x7   :  { %18 = vsyncpa [#allocation7 + $0x1], 0  ;;  %s907_s24 = smov 0   ;;  %s909_s25 = smov 0  }
   0x8   :  { %s911_s26 = smov 0   ;;  %s913_s27 = smov 0  }
   0x9   :  { %s915_s28 = smov 0   ;;  %s917_s29 = smov 0  }
   0xa LB: > { %s669_s30 = sadd.s32 4294967295, %s865_s29   ;;  %s670_s8 = sadd.s32 4294967294, %s865_s29   ;;  %s865_s29 = sphi %s917_s29, %s24_s29   ;;  %s861_s28 = sphi %s915_s28, %s1096_s28   ;;  %s857_s27 = sphi %s913_s27, %s1095_s27   ;;  %s853_s26 = sphi %s911_s26, %s1094_s26   ;;  %s849_s25 = sphi %s909_s25, %s1093_s25   ;;  %s845_s24 = sphi %s907_s24, %s1092_s24  }
   0xb   : > { %s36_s9 = sadd.s32 1, %s861_s28  ;;  %s188_s10 = sadd.s32 1, %s853_s26 }
   0xc   : > { %p38_p0 = scmp.ge.s32.totalorder %s36_s9, 2  ;;  %p198_p1 = scmp.ne.s32.totalorder %s853_s26, %s849_s25 }
   0xd   : > { %p199_p2 = scmp.eq.s32.totalorder %s669_s30, 1  ;;  %p204_p3 = scmp.ne.s32.totalorder %s849_s25, %s845_s24 }
   0xe   : > { %s1098_s9 = smov (%p38_p0, %s36_s9), 0  ;;  %p205_p5 = scmp.eq.s32.totalorder %s670_s8, 1 }
   0xf   : > { %p947_p4 = por %p199_p2, %p198_p1  ;;  %s183_s12 = ssub.s32 %s861_s28, %s1098_s9 }
  0x10   : > { %p673_p6 = scmp.ge.s32.totalorder %s865_s29, 1  ;;  %p186_p7 = scmp.eq.s32.totalorder %s183_s12, 0 }
  0x11   : > { %p954_p8 = por %p205_p5, %p204_p3  ;;  %p284_p9 = scmp.lt.s32.totalorder %s865_s29, 3 }
  0x12   : > { %s960_s14 = scalar_select %p186_p7, %s853_s26, %s188_s10  }
  0x13   : > { %p285_p10 = pnand %p673_p6, %p284_p9 }
  0x14   : > { %p331_p11 = scmp.lt.s32.totalorder (!%p285_p10), %s857_s27, 1  ;;  %s1089_s1 = sld [smem:[#allocation11_spill]] (!%p285_p10) }
  0x15   : > { %288 = sbr.rel (%p285_p10) target bundleno = 692 (0x2b4), region = 44  ;;  %s1090_s0 = sld [smem:[#allocation10_spill]] (!%p285_p10) }
  0x16   : > { %s1091_s2 = sld [smem:[#allocation12_spill]] (!%p285_p10)  ;;  %s687_s12 = sshll.u32 (!%p285_p10), %s857_s27, 3 }
  0x17   : > { %s535_s18 = scalar_lea.hbm (!%p285_p10), %s1083_s7, %s687_s12 }
  0x1a   : > { %v354_v0 = vld [vmem:[%s1080_s4 + $0x18] sm:$0xff]  ;;  %v353_v1 = vld [vmem:[%s1080_s4 + $0x10] sm:$0xff]  ;;  %v352_v4 = vld [vmem:[%s1080_s4 + $0x8] sm:$0xff]  ;;  %s332_s8 = scalar_select %p331_p11, %s857_s27, 1  ;;  %vm355_vm0 = vcmask 261120   ;;  %vm465_vm1 = vcmask 64512  }
  0x1b   : > { %371 = vmatpush.msra.mxu0 %v354_v0  ;;  %v413_v2 = vld [vmem:[%s1079_s3 + $0x18] sm:$0xff]  ;;  %v412_v3 = vld [vmem:[%s1079_s3 + $0x10] sm:$0xff]  ;;  %v411_v5 = vld [vmem:[%s1079_s3 + $0x8] sm:$0xff]  ;;  %s775_s27 = scalar_lea.hbm %s1083_s7, 16 }
  0x1c   : > { %430 = vmatpush.msra.mxu2 %v413_v2  ;;  %v351_v6 = vld [vmem:[%s1080_s4] sm:$0xff]  ;;  %s676_s17 = sshll.u32 %s332_s8, 3  ;;  %v384_v13 = vld [vmem:[%s1081_s5 + $0x18] sm:$0xff]  ;;  %v383_v14 = vld [vmem:[%s1081_s5 + $0x10] sm:$0xff] }
  0x1d   : > { %372 = vmatpush.msra.mxu0 %v353_v1  ;;  %s341_s20 = scalar_lea.vmem %s1089_s1, %s676_s17  ;;  %v410_v7 = vld [vmem:[%s1079_s3] sm:$0xff]  ;;  %s337_s10 = scalar_lea.vmem %s1090_s0, %s676_s17  ;;  %400 = vmatpush.msra.mxu1 %v384_v13  ;;  %v382_v15 = vld [vmem:[%s1081_s5 + $0x8] sm:$0xff] }
  0x1e   : > { %431 = vmatpush.msra.mxu2 %v412_v3  ;;  %v350_v8 = vld [vmem:[%s341_s20] sm:$0xff]  ;;  %s345_s22 = scalar_lea.vmem %s1091_s2, %s676_s17  ;;  %s1019_s17 = sand.u32 1, %s849_s25  }
  0x1f   : > { %373 = vmatpush.msra.mxu0 %v352_v4  ;;  %v409_v9 = vld [vmem:[%s337_s10] sm:$0xff]  ;;  %401 = vmatpush.msra.mxu1 %v383_v14  ;;  %s674_s10 = sshll.u32 %s1019_s17, 3  ;;  %s539_s20 = sshll.u32 %s535_s18, 4  ;;  %s540_s20 = int_to_ptr.hbm [resolvable:$true] %s539_s20 }
  0x20   : > { %432 = vmatpush.msra.mxu2 %v411_v5  ;;  %v381_v16 = vld [vmem:[%s1081_s5] sm:$0xff]  ;;  %s330_s8 = scalar_lea.vmem [#allocation6], %s674_s10  ;;  %s509_s21 = scalar_lea.sflag [#allocation7], %s1019_s17 }
  0x21   : > { %374 = vmatpush.msra.mxu0 %v351_v6  ;;  %402 = vmatpush.msra.mxu1 %v382_v15  ;;  %v380_v17 = vld [vmem:[%s345_s22] sm:$0xff]  ;;  %s537_s19 = sshll.u32 %s330_s8, 4  ;;  %s769_s22 = sshra.s32 %s540_s20, 4  ;;  %s538_s19 = int_to_ptr.vmem [resolvable:$true] %s537_s19  ;;  %s770_s22 = int_to_ptr.hbm [resolvable:$true] %s769_s22 }
  0x22   : > { %679 = vmatmul.msk.f32.vlgmr.msra.gmra.mxu0 %vm355_vm0, %v350_v8  ;;  %433 = vmatpush.msra.mxu2 %v410_v7  ;;  %s771_s23 = scalar_lea.hbm %s770_s22, 8  ;;  %p776_p1 = scmp.lt.s32.totalorder %s770_s22, %s1083_s7 }
  0x23   : > { %681 = vmatmul.msk.f32.vlgmr.msra.gmra.mxu2 %vm355_vm0, %v409_v9  ;;  %403 = vmatpush.msra.mxu1 %v381_v16  ;;  %p772_p12 = scmp.ne.s32.totalorder %s770_s22, %s771_s23  ;;  %p777_p2 = scmp.lt.s32.totalorder %s775_s27, %s771_s23 }
  0x24   : > { %680 = vmatmul.msk.f32.vlgmr.msra.gmra.mxu1 %vm355_vm0, %v380_v17 }
  0x25   : > { %p773_p13 = pnand %p772_p12, %p947_p4  ;;  %p778_p3 = por %p777_p2, %p776_p1 }
  0x27   : > { %p774_p0 = pneg %p773_p13 }
  0x29   : > { %p779_p5 = pnand %p778_p3, %p774_p0 }
  0x9f   : > { %v376_v10 = vpop.f32.mrf.mxu0 }
  0xa0   : > { %379 = vst.msk [vmem:[#allocation2] sm:$0xff] %vm355_vm0, %v376_v10 }
  0xa1   : > { %v405_v20 = vpop.f32.mrf.mxu1 }
  0xa2   : > { %408 = vst.msk [vmem:[#allocation3] sm:$0xff] %vm355_vm0, %v405_v20 }
  0xa6   : > { %v435_v12 = vpop.f32.mrf.mxu2 }
  0xa7   : > { %v438_v11 = vld [vmem:[#allocation2] sm:$0xff] }
  0xa8   : > { %682 = vmatpush.xpose.msk.msra.mxu3 %vm355_vm0, %v438_v11 }
  0xa9   : > { %v477_v26 = vld [vmem:[#allocation3] sm:$0xff] }
  0xab   : > { %683 = vmatmul.msk.f32.vlgmr.msra.gmra.mxu3 %vm355_vm0, %v435_v12 }
  0xac   : > { %496 = vmatpush.msrb.mxu3 %v477_v26 }
 0x12e   : > { %v462_v18 = vpop.f32.mrf.mxu3 }
 0x12f   : > { %v466_v19 = vsel %vm465_vm1, %v462_v18, -inf }
 0x130   : > { %467 = vmax.xlane.f32.xlu0 %v466_v19 }
 0x1a3   : > { %v468_v21 = vpop.xlane.xlu0 %467 }
 0x1a4   : > { %v469_v22 = vsub.f32 %v462_v18, %v468_v21 }
 0x1a6   : > { %v470_v23 = vmul.f32 1.442695, %v469_v22 }
 0x1a8   : > { %751 = vpow2.f32 %v470_v23 }
 0x1ae   : > { %v752_v24 = vpop.eup %751 }
 0x1af   : > { %v472_v25 = vsel %vm465_vm1, %v752_v24, 0.0 }
 0x1b0   : > { %473 = vadd.xlane.f32.xlu0 %v472_v25 }
 0x223   : > { %v474_v27 = vpop.xlane.xlu0 %473 }
 0x224   : > { %753 = vrcp.f32 %v474_v27 }
 0x22a   : > { %v754_v28 = vpop.eup %753 }
 0x22b   : > { %v476_v29 = vmul.f32 %v754_v28, %v752_v24 }
 0x22d   : > { %684 = vmatmul.msk.f32.vlgmr.msrb.gmra.mxu3 %vm465_vm1, %v476_v29  ;;  %502 = vst.msk [vmem:[%s330_s8] sm:$0xff] %vm465_vm1, %v476_v29 }
 0x22e   : > { %782 = shalt.err (!%p779_p5)
}
 0x22f   : > { %692 = dma.vmem_to_hbm [thread:$0]  (%p947_p4), %s538_s19, 128, %s540_s20, %s509_s21  }
 0x230   : > { %s520_s16 = scalar_lea.hbm %s1082_s6, %s687_s12  ;;  %s323_s18 = scalar_lea.vmem [#allocation4], %s674_s10 }
 0x231   : > { %s522_s0 = sshll.u32 %s323_s18, 4  ;;  %s524_s30 = sshll.u32 %s520_s16, 4  ;;  %s523_s0 = int_to_ptr.vmem [resolvable:$true] %s522_s0  ;;  %s525_s30 = int_to_ptr.hbm [resolvable:$true] %s524_s30 }
 0x232   : > { %s504_s1 = scalar_lea.sflag [#allocation5], %s1019_s17  ;;  %s797_s2 = sshra.s32 %s525_s30, 4  ;;  %s798_s2 = int_to_ptr.hbm [resolvable:$true] %s797_s2 }
 0x233   : > { %s799_s22 = scalar_lea.hbm %s798_s2, 8  ;;  %s803_s12 = scalar_lea.hbm %s1082_s6, 16 }
 0x234   : > { %p800_p6 = scmp.ne.s32.totalorder %s798_s2, %s799_s22  ;;  %p804_p10 = scmp.lt.s32.totalorder %s798_s2, %s1082_s6 }
 0x235   : > { %p805_p11 = scmp.lt.s32.totalorder %s803_s12, %s799_s22 }
 0x236   : > { %p801_p7 = pnand %p800_p6, %p947_p4 }
 0x237   : > { %p806_p12 = por %p805_p11, %p804_p10 }
 0x238   : > { %p802_p9 = pneg %p801_p7 }
 0x23a   : > { %p807_p13 = pnand %p806_p12, %p802_p9 }
 0x2b0   : > { %v498_v30 = vpop.f32.mrf.mxu3 }
 0x2b1   : > { %501 = vst.msk [vmem:[%s323_s18] sm:$0xff] %vm355_vm0, %v498_v30 }
 0x2b2   : > { %810 = shalt.err (!%p807_p13)
}
 0x2b3   : > { %691 = dma.vmem_to_hbm [thread:$0]  (%p947_p4), %s523_s0, 128, %s525_s30, %s504_s1  }
 0x2b4 PF: > { %p702_p0 = scmp.ge.s32.totalorder %s865_s29, 2  ;;  %s551_s17 = sand.u32 1, %s845_s24  }
 0x2b5   : > { %s552_s23 = scalar_lea.sflag [#allocation5], %s551_s17 }
 0x2b6   : > { %p696_p1 = pnand %p702_p0, %p954_p8 }
 0x2b8   : > { %p697_p2 = pneg %p696_p1 }
 0x2ba   : > { %836 = dma.done.wait (%p697_p2), %s552_s23, 128  }
 0x2bb   : > { %838 = vsyncadd (%p697_p2), %s552_s23, 4294967168  ;;  %s562_s27 = scalar_lea.sflag [#allocation7], %s551_s17 }
 0x2bc   : > { %840 = dma.done.wait (%p697_p2), %s562_s27, 128  }
 0x2bd   : > { %842 = vsyncadd (%p697_p2), %s562_s27, 4294967168  ;;  %s24_s29 = sadd.s32 1, %s865_s29   ;;  %s1092_s24 = smov %s849_s25 }
 0x2be   : > { %p21_p3 = scmp.ge.s32.totalorder %s24_s29, 4   ;;  %s1093_s25 = smov %s853_s26 }
 0x2bf   : > { %s1094_s26 = smov %s960_s14  ;;  %s1095_s27 = smov %s861_s28 }
 0x2c0   : > { %s1096_s28 = smov %s1098_s9  ;;  %23 = sbr.rel (!%p21_p3) target bundleno = 10 (0xa), region = 106 }
 0x2c5   :  { %568 = vsyncpa [#allocation5], 1 }
 0x2c6   :  { %570 = vsyncpa [#allocation5 + $0x1], 1 }
 0x2c7   :  { %571 = vsyncpa [#allocation7], 1 }
 0x2c8   :  { %573 = vsyncpa [#allocation7 + $0x1], 1 }

</bundles_post_ra>
